<compile_context>
chip_gen: v7x
topology: tpu7x:2x2x1
jax: 0.10.0
libtpu: 0.0.40
codegen_flags: <defaults>
</compile_context>

<pallas_src>
import jax
import jax.numpy as jnp
from jax.experimental import pallas as pl
from jax.experimental.pallas import tpu as pltpu

# Rounding boundary of 1.5*tanh(x) + 0.5*tanh(-3x):  y(X0) = 0.5 exactly.
_X0 = 0.7946759647

_LANE_CANDIDATES = (4096, 2048, 1024, 512, 256, 128)   # lane-dense widths, widest first
_TARGET_TILE_BYTES = 4 * 1024 * 1024                   # ~4 MiB blocks
_VMEM_LIMIT_BYTES = 32 * 1024 * 1024                   # in+out double-buffered ~16 MiB + headroom


def _ternary_tanh_kernel(x_ref, o_ref):
    # Pure VPU: two compares + two selects/casts + one subtract per element.
    x = x_ref[...].astype(jnp.float32)
    pos = (x > _X0).astype(o_ref.dtype)
    neg = (x < -_X0).astype(o_ref.dtype)
    o_ref[...] = pos - neg


def _ternary_tanh_jnp(x):
    # Same semantics, plain jnp; used for the <=127-element ragged tail.
    xf = x.astype(jnp.float32)
    pos = (xf > _X0).astype(x.dtype)
    neg = (xf < -_X0).astype(x.dtype)
    return pos - neg


def _sublane_multiple(dtype):
    itemsize = jnp.dtype(dtype).itemsize
    if itemsize >= 4:
        return 8
    if itemsize == 2:
        return 16
    return 32


def ternary_tanh(x):
    """Elementwise TernaryTanh forward. Accepts any shape (e.g. NCHW)."""
    orig_shape = x.shape
    dtype = x.dtype
    flat = x.reshape(-1)
    n = flat.shape[0]
    itemsize = jnp.dtype(dtype).itemsize

    # Largest 128-aligned prefix goes through the kernel; tiny tail in jnp.
    n_main = (n // 128) * 128
    if n_main == 0:
        return _ternary_tanh_jnp(flat).reshape(orig_shape)

    lane_w = 128
    for w in _LANE_CANDIDATES:
        if n_main % w == 0:
            lane_w = w
            break

    rows = n_main // lane_w
    sub = _sublane_multiple(dtype)
    if rows <= sub:
        row_tile = rows  # equals the full array dim -> always a legal block
    else:
        bytes_per_row = lane_w * itemsize
        row_tile = min(rows, max(1, _TARGET_TILE_BYTES // bytes_per_row))
        if rows >= 2 * sub:
            # Guarantee >= 2 grid steps so v7x's two TensorCores both get work.
            row_tile = min(row_tile, (rows // 2 // sub) * sub)
        row_tile = max(sub, (row_tile // sub) * sub)

    grid = (pl.cdiv(rows, row_tile),)

    x_main = flat if n_main == n else flat[:n_main]
    x2d = x_main.reshape(rows, lane_w)

    out2d = pl.pallas_call(
        _ternary_tanh_kernel,
        out_shape=jax.ShapeDtypeStruct((rows, lane_w), dtype),
        grid_spec=pltpu.PrefetchScalarGridSpec(
            num_scalar_prefetch=0,
            grid=grid,
            in_specs=[pl.BlockSpec((row_tile, lane_w), lambda i: (i, 0))],
            out_specs=pl.BlockSpec((row_tile, lane_w), lambda i: (i, 0)),
        ),
        compiler_params=pltpu.CompilerParams(
            dimension_semantics=("parallel",),
            vmem_limit_bytes=_VMEM_LIMIT_BYTES,
        ),
    )(x2d)

    main = out2d.reshape(-1)
    if n_main == n:
        return main.reshape(orig_shape)
    tail = _ternary_tanh_jnp(flat[n_main:])
    return jnp.concatenate([main, tail]).reshape(orig_shape)


def _reference(x):
    # Original two-tanh formulation from the PyTorch module.
    y = 1.5 * jnp.tanh(x) + 0.5 * jnp.tanh(-3.0 * x)
    return jnp.round(y).astype(x.dtype)


# TODO(synk): TernaryTanhF.backward (straight-through estimator) is not
# implemented; this kernel covers the forward pass only.

if __name__ == "__main__":
    key = jax.random.PRNGKey(0)
    # NCHW input, small shapes consistent with a conv-style activation.
    x = jax.random.normal(key, (2, 4, 16, 16), dtype=jnp.float32) * 2.0

    out = jax.block_until_ready(ternary_tanh(x))
    ref = jax.block_until_ready(_reference(x))

    assert out.shape == x.shape and out.dtype == x.dtype
    # Threshold form is exact in real arithmetic; allow disagreement only in an
    # ulp-scale neighborhood of the rounding boundary |x| ~ X0 (where the
    # two-tanh reference is itself fuzzy).
    mismatch = out != ref
    near_boundary = jnp.abs(jnp.abs(x) - _X0) < 1e-3
    assert bool(jnp.all(jnp.logical_or(~mismatch, near_boundary))), "mismatch vs reference"
    assert bool(jnp.all((out == -1.0) | (out == 0.0) | (out == 1.0))), "non-ternary output"

    # Ragged size (not a multiple of 128): exercises the prefix + jnp-tail path.
    x2 = jax.random.normal(jax.random.PRNGKey(1), (2, 4, 131), dtype=jnp.float32)
    out2 = jax.block_until_ready(ternary_tanh(x2))
    ref2 = _reference(x2)
    ok2 = jnp.logical_or(out2 == ref2, jnp.abs(jnp.abs(x2) - _X0) < 1e-3)
    assert out2.shape == x2.shape and bool(jnp.all(ok2)), "ragged-path mismatch"

    print("KERNEL_OK")
</pallas_src>

<mosaic_0001>
module attributes {stable_mosaic.version = 11 : i64} {
  func.func @_ternary_tanh_kernel(%arg0: i32, %arg1: memref<1x2048xf32, #tpu.memory_space<vmem>>, %arg2: memref<1x2048xf32, #tpu.memory_space<vmem>>) attributes {dimension_semantics = [#tpu.dimension_semantics<parallel>], iteration_bounds = array<i64: 1>, scalar_prefetch = 0 : i64, scratch_operands = 0 : i64, tpu.core_type = #tpu.core_type<tc>, window_params = [{transform_indices = @transform_0, window_bounds = array<i64: 1, 2048>}, {transform_indices = @transform_1, window_bounds = array<i64: 1, 2048>}]} {
    %c0 = arith.constant 0 : index
    %c0_0 = arith.constant 0 : index
    %0 = vector.load %arg1[%c0, %c0_0] : memref<1x2048xf32, #tpu.memory_space<vmem>>, vector<1x2048xf32>
    %cst = arith.constant 0.794675946 : f32
    %1 = vector.broadcast %cst : f32 to vector<1x2048xf32>
    %2 = arith.cmpf ogt, %0, %1 : vector<1x2048xf32>
    %3 = arith.extui %2 : vector<1x2048xi1> to vector<1x2048xi32>
    %4 = arith.sitofp %3 : vector<1x2048xi32> to vector<1x2048xf32>
    %cst_1 = arith.constant -0.794675946 : f32
    %5 = vector.broadcast %cst_1 : f32 to vector<1x2048xf32>
    %6 = arith.cmpf olt, %0, %5 : vector<1x2048xf32>
    %7 = arith.extui %6 : vector<1x2048xi1> to vector<1x2048xi32>
    %8 = arith.sitofp %7 : vector<1x2048xi32> to vector<1x2048xf32>
    %9 = arith.subf %4, %8 : vector<1x2048xf32>
    %c0_2 = arith.constant 0 : index
    %c0_3 = arith.constant 0 : index
    %10 = vector.load %arg2[%c0_2, %c0_3] : memref<1x2048xf32, #tpu.memory_space<vmem>>, vector<1x2048xf32>
    tpu.vector_store %arg2[%c0_2, %c0_3], %9 {strides = array<i32>} : memref<1x2048xf32, #tpu.memory_space<vmem>>, vector<1x2048xf32>,
    return
  }
  func.func @transform_0(%arg0: i32) -> (i32, i32) {
    %c0_i32 = arith.constant 0 : i32
    %c0_i32_0 = arith.constant 0 : i32
    return %arg0, %c0_i32 : i32, i32
  }
  func.func @transform_1(%arg0: i32) -> (i32, i32) {
    %c0_i32 = arith.constant 0 : i32
    %c0_i32_0 = arith.constant 0 : i32
    return %arg0, %c0_i32 : i32, i32
  }
}

</mosaic_0001>

<bundles_post_ra>
// kernel: tpu_custom_call.1
= control target key start
LH: loop header
LB: loop body
LE: loop exit
PB: predicated region body
PF: predicated region fallthrough
CT: control target
= control target key end

     0   :  { %6 = vsyncpa [#allocation3], 0  ;;  %s146_s0 = inlined_call_operand.hbm [shape: f32[1,2048], index: 0, kind: input, shape index: {}]   ;;  %s147_s1 = inlined_call_operand.hbm [shape: f32[1,2048], index: 1, kind: output, shape index: {}]  }
   0x1   :  { %7 = vsyncpa [#allocation4], 0  ;;  %s109_s6 = smov [#allocation2]   ;;  %s61_s10 = scalar_lea.hbm %s146_s0, 256 }
   0x2   :  { %s14_s7 = sshll.u32 %s109_s6, 4  ;;  %p62_p0 = scmp.ne.s32.totalorder %s146_s0, %s61_s10  ;;  %s15_s7 = int_to_ptr.vmem [resolvable:$true] %s14_s7 }
   0x3   :  { %p65_p1 = scmp.lt.u32.totalorder %s61_s10, %s146_s0 }
   0x5   :  { %p67_p2 = pnand %p65_p1, %p62_p0 }
   0x7   :  { %70 = shalt.err (!%p67_p2)
}
   0x8   :  { %s71_s15 = scalar_lea.vmem %s15_s7, 256  ;;  %p76_p4 = scmp.lt.s32.totalorder %s15_s7, %s15_s7 }
   0x9   :  { %p72_p3 = scmp.ne.s32.totalorder %s15_s7, %s71_s15  ;;  %p77_p5 = scmp.lt.s32.totalorder %s71_s15, %s71_s15 }
   0xb   :  { %p78_p6 = por %p77_p5, %p76_p4 }
   0xd   :  { %p79_p7 = pnand %p78_p6, %p72_p3 }
   0xf   :  { %82 = shalt.err (!%p79_p7)
}
  0x10   :  { %17 = dma.hbm_to_vmem [thread:$0]  %s146_s0, 256, %s15_s7, [#allocation3]  }
  0x11   :  { %105 = dma.done.wait [#allocation3], 256  }
  0x12   :  { %106 = vsyncadd [#allocation3], 4294967040  ;;  %v21_v0 = vld [vmem:[#allocation2] sm:$0xff]  ;;  %v22_v1 = vld [vmem:[#allocation2 + $0x8] sm:$0xff]  ;;  %s110_s18 = smov [#allocation5]   ;;  %v111_v2 = vmov 0.0  }
  0x13   :  { %s45_s19 = sshll.u32 %s110_s18, 4  ;;  %vm23_vm0 = vcmp.gt.f32.partialorder %v21_v0, 0.79467595  ;;  %vm29_vm1 = vcmp.lt.f32.partialorder %v21_v0, -0.79467595  ;;  %s46_s19 = int_to_ptr.vmem [resolvable:$true] %s45_s19 }
  0x14   :  { %vm24_vm2 = vcmp.gt.f32.partialorder %v22_v1, 0.79467595  ;;  %v54_v3 = vsel %vm23_vm0, 1.0, %v111_v2  ;;  %v56_v4 = vsel %vm29_vm1, 1.0, %v111_v2  ;;  %vm30_vm3 = vcmp.lt.f32.partialorder %v22_v1, -0.79467595  ;;  %p88_p9 = scmp.lt.s32.totalorder %s46_s19, %s46_s19 }
  0x15   :  { %v55_v5 = vsel %vm24_vm2, 1.0, %v111_v2  ;;  %v35_v6 = vsub.f32 %v54_v3, %v56_v4  ;;  %v57_v7 = vsel %vm30_vm3, 1.0, %v111_v2  ;;  %s83_s0 = scalar_lea.vmem %s46_s19, 256 }
  0x16   :  { %v36_v8 = vsub.f32 %v55_v5, %v57_v7  ;;  %p84_p8 = scmp.ne.s32.totalorder %s46_s19, %s83_s0  ;;  %p89_p10 = scmp.lt.s32.totalorder %s83_s0, %s83_s0 }
  0x17   :  { %37 = vst [vmem:[#allocation5] sm:$0xff] %v35_v6 }
  0x18   :  { %38 = vst [vmem:[#allocation5 + $0x8] sm:$0xff] %v36_v8  ;;  %p90_p11 = por %p89_p10, %p88_p9 }
  0x1a   :  { %p91_p12 = pnand %p90_p11, %p84_p8 }
  0x1c   :  { %94 = shalt.err (!%p91_p12)
}
  0x1d   :  { %s95_s22 = scalar_lea.hbm %s147_s1, 256 }
  0x1e   :  { %p96_p13 = scmp.ne.s32.totalorder %s147_s1, %s95_s22  ;;  %p99_p0 = scmp.lt.u32.totalorder %s95_s22, %s147_s1 }
  0x20   :  { %p101_p1 = pnand %p99_p0, %p96_p13 }
  0x22   :  { %104 = shalt.err (!%p101_p1)
}
  0x23   :  { %48 = dma.vmem_to_hbm [thread:$0]  %s46_s19, 256, %s147_s1, [#allocation4]  }
  0x24   :  { %107 = dma.done.wait [#allocation4], 256  }
  0x25   :  { %108 = vsyncadd [#allocation4], 4294967040 }
  0x26   :  { %52 = vsyncpa [#allocation3], 1 }
  0x27   :  { %53 = vsyncpa [#allocation4], 1 }

</bundles_post_ra>
